<compile_context>
chip_gen: v7x
topology: tpu7x:2x2x1
jax: 0.10.0
libtpu: 0.0.40
codegen_flags: <defaults>
</compile_context>

<pallas_src>
import functools

import jax
import jax.numpy as jnp
from jax.experimental import pallas as pl
from jax.experimental.pallas import tpu as pltpu

IGNORE_INDEX = 255
EPS = 1e-5
LANE = 128


def _dice_sums_kernel(score_ref, label_ref, inter_ref, card_ref,
                      acc_i_ref, acc_c_ref, *, ignore_index, hw, rows_tile):
    """Accumulates per-class intersection and cardinality over pixel tiles."""
    t = pl.program_id(1)

    @pl.when(t == 0)
    def _():
        acc_i_ref[...] = jnp.zeros_like(acc_i_ref)
        acc_c_ref[...] = jnp.zeros_like(acc_c_ref)

    scores = score_ref[...]                  # [C, R, 128] f32
    label = label_ref[...]                   # [R, 128]    i32

    # mask = label != ignore_index ; masked scores -> uniform softmax there
    keep = label != ignore_index
    x = jnp.where(keep[None, :, :], scores, 0.0)            # [C, R, 128]

    # softmax over the class axis (leading dim -> per-vreg VALU ops, no XLU)
    m = jnp.max(x, axis=0, keepdims=True)
    e = jnp.exp(x - m)
    denom = jnp.sum(e, axis=0, keepdims=True)                # [1, R, 128]
    p = e * pl.reciprocal(denom)                             # exact reciprocal

    # one-hot(label): ignore_index never matches any class -> all zeros there
    cls_iota = jax.lax.broadcasted_iota(jnp.int32, x.shape, 0)
    one_hot = (label[None, :, :] == cls_iota).astype(jnp.float32)

    # in-kernel validity of the padded pixel tail (no streamed mask array)
    row_idx = t * rows_tile + jax.lax.broadcasted_iota(
        jnp.int32, (rows_tile, LANE), 0)
    lane_idx = jax.lax.broadcasted_iota(jnp.int32, (rows_tile, LANE), 1)
    valid = ((row_idx * LANE + lane_idx) < hw).astype(jnp.float32)  # [R, 128]

    # elementwise accumulation only (no cross-lane reductions in the hot loop)
    acc_i_ref[...] += p * one_hot
    acc_c_ref[...] += p * valid[None, :, :] + one_hot

    # epilogue: a single cross-lane/sublane reduce per batch row
    @pl.when(t == pl.num_programs(1) - 1)
    def _():
        inter_ref[...] = jnp.sum(jnp.sum(acc_i_ref[...], axis=2),
                                 axis=1, keepdims=True)
        card_ref[...] = jnp.sum(jnp.sum(acc_c_ref[...], axis=2),
                                axis=1, keepdims=True)


def dice_loss(cls_score, label, *, ignore_index=IGNORE_INDEX, eps=EPS,
              max_rows_tile=64):
    """cls_score: [N, C, H, W] float32, label: [N, H, W] int -> scalar loss."""
    N, C, H, W = cls_score.shape
    HW = H * W

    # Split the pixel axis into 128-lane rows; tile rows in multiples of 8
    # sublanes.  max_rows_tile=64 -> 8192 pixels (lanes) per grid step.
    rows = pl.cdiv(HW, LANE)
    rows_tile = min(max_rows_tile, ((rows + 7) // 8) * 8)
    rows_pad = ((rows + rows_tile - 1) // rows_tile) * rows_tile
    HW_pad = rows_pad * LANE

    # Free reshapes (no HBM transpose); pad only the small pixel tail.
    scores = cls_score.astype(jnp.float32).reshape(N, C, HW)
    label_flat = label.reshape(N, HW).astype(jnp.int32)
    pad = HW_pad - HW
    if pad:
        scores = jnp.pad(scores, ((0, 0), (0, 0), (0, pad)))
        label_flat = jnp.pad(label_flat, ((0, 0), (0, pad)),
                             constant_values=ignore_index)
    scores = scores.reshape(N, C, rows_pad, LANE)
    label_flat = label_flat.reshape(N, rows_pad, LANE)

    grid = (N, rows_pad // rows_tile)
    kernel = functools.partial(_dice_sums_kernel, ignore_index=ignore_index,
                               hw=HW, rows_tile=rows_tile)

    inter, card = pl.pallas_call(
        kernel,
        out_shape=(jax.ShapeDtypeStruct((N, C, 1), jnp.float32),
                   jax.ShapeDtypeStruct((N, C, 1), jnp.float32)),
        grid_spec=pltpu.PrefetchScalarGridSpec(
            num_scalar_prefetch=0,
            grid=grid,
            in_specs=[
                pl.BlockSpec((None, C, rows_tile, LANE),
                             lambda n, t: (n, 0, t, 0)),
                pl.BlockSpec((None, rows_tile, LANE),
                             lambda n, t: (n, t, 0)),
            ],
            out_specs=[
                pl.BlockSpec((None, C, 1), lambda n, t: (n, 0, 0)),
                pl.BlockSpec((None, C, 1), lambda n, t: (n, 0, 0)),
            ],
            scratch_shapes=[
                pltpu.VMEM((C, rows_tile, LANE), jnp.float32),
                pltpu.VMEM((C, rows_tile, LANE), jnp.float32),
            ],
        ),
        compiler_params=pltpu.CompilerParams(
            dimension_semantics=("parallel", "arbitrary")),
    )(scores, label_flat)

    # Per-batch partial sums -> per-class totals (sum over N in the wrapper
    # keeps the batch grid axis fully parallel across TensorCores).
    inter = jnp.sum(inter[:, :, 0], axis=0)   # [C]
    card = jnp.sum(card[:, :, 0], axis=0)     # [C]
    dice = jnp.mean(2.0 * inter / (card + eps))
    return 1.0 - dice


def _dice_loss_ref(cls_score, label, *, ignore_index=IGNORE_INDEX, eps=EPS):
    """Pure-JAX reference mirroring the PyTorch forward exactly."""
    label4 = label[:, None, :, :]
    mask = (label4 != ignore_index).astype(cls_score.dtype)
    x = cls_score * mask
    C = cls_score.shape[1]
    one_hot = jnp.stack(
        [(label4[:, 0] == c).astype(jnp.float32) for c in range(C)], axis=1)
    p = jax.nn.softmax(x, axis=1)
    dims = (0, 2, 3)
    inter = jnp.sum(p * one_hot, dims)
    card = jnp.sum(p + one_hot, dims)
    return 1.0 - jnp.mean(2.0 * inter / (card + eps))


if __name__ == "__main__":
    key = jax.random.PRNGKey(0)
    k1, k2 = jax.random.split(key)

    N, C, H, W = 2, 4, 16, 16
    cls_score = jax.random.normal(k1, (N, C, H, W), dtype=jnp.float32)
    # labels in [0, C) plus a few ignore_index pixels
    label = jax.random.randint(k2, (N, H, W), 0, C).astype(jnp.int32)
    label = label.at[0, 0, :4].set(IGNORE_INDEX)

    out = dice_loss(cls_score, label)
    out = jax.block_until_ready(out)

    ref = _dice_loss_ref(cls_score, label)
    assert jnp.allclose(out, ref, atol=1e-5, rtol=1e-5), (out, ref)

    print("KERNEL_OK")
</pallas_src>

<mosaic_0001>
module attributes {stable_mosaic.version = 11 : i64} {
  func.func @_dice_sums_kernel(%arg0: i32, %arg1: i32, %arg2: memref<1x4x8x128xf32, #tpu.memory_space<vmem>>, %arg3: memref<1x8x128xi32, #tpu.memory_space<vmem>>, %arg4: memref<1x4x1xf32, #tpu.memory_space<vmem>>, %arg5: memref<1x4x1xf32, #tpu.memory_space<vmem>>, %arg6: memref<4x8x128xf32, #tpu.memory_space<vmem>>, %arg7: memref<4x8x128xf32, #tpu.memory_space<vmem>>) attributes {dimension_semantics = [#tpu.dimension_semantics<parallel>, #tpu.dimension_semantics<arbitrary>], iteration_bounds = array<i64: 2, 1>, scalar_prefetch = 0 : i64, scratch_operands = 2 : i64, tpu.core_type = #tpu.core_type<tc>, window_params = [{transform_indices = @transform_0, window_bounds = array<i64: 1, 4, 8, 128>}, {transform_indices = @transform_1, window_bounds = array<i64: 1, 8, 128>}, {transform_indices = @transform_2, window_bounds = array<i64: 1, 4, 1>}, {transform_indices = @transform_3, window_bounds = array<i64: 1, 4, 1>}]} {
    %c0_i32 = arith.constant 0 : i32
    %0 = arith.cmpi eq, %arg1, %c0_i32 : i32
    %1 = arith.extui %0 : i1 to i32
    %c0_i32_0 = arith.constant 0 : i32
    %2 = arith.cmpi ne, %1, %c0_i32_0 : i32
    scf.if %2 {
      %cst_23 = arith.constant 0.000000e+00 : f32
      %56 = vector.broadcast %cst_23 : f32 to vector<4x8x128xf32>
      %c0_24 = arith.constant 0 : index
      %c0_25 = arith.constant 0 : index
      %c0_26 = arith.constant 0 : index
      %57 = vector.load %arg6[%c0_24, %c0_25, %c0_26] : memref<4x8x128xf32, #tpu.memory_space<vmem>>, vector<4x8x128xf32>
      tpu.vector_store %arg6[%c0_24, %c0_25, %c0_26], %56 {strides = array<i32>} : memref<4x8x128xf32, #tpu.memory_space<vmem>>, vector<4x8x128xf32>,
      %cst_27 = arith.constant 0.000000e+00 : f32
      %58 = vector.broadcast %cst_27 : f32 to vector<4x8x128xf32>
      %c0_28 = arith.constant 0 : index
      %c0_29 = arith.constant 0 : index
      %c0_30 = arith.constant 0 : index
      %59 = vector.load %arg7[%c0_28, %c0_29, %c0_30] : memref<4x8x128xf32, #tpu.memory_space<vmem>>, vector<4x8x128xf32>
      tpu.vector_store %arg7[%c0_28, %c0_29, %c0_30], %58 {strides = array<i32>} : memref<4x8x128xf32, #tpu.memory_space<vmem>>, vector<4x8x128xf32>,
    } else {
    }
    %c0 = arith.constant 0 : index
    %c0_1 = arith.constant 0 : index
    %c0_2 = arith.constant 0 : index
    %c0_3 = arith.constant 0 : index
    %3 = vector.load %arg2[%c0, %c0_1, %c0_2, %c0_3] : memref<1x4x8x128xf32, #tpu.memory_space<vmem>>, vector<1x4x8x128xf32>
    %4 = vector.shape_cast %3 : vector<1x4x8x128xf32> to vector<4x8x128xf32>
    %c0_4 = arith.constant 0 : index
    %c0_5 = arith.constant 0 : index
    %c0_6 = arith.constant 0 : index
    %5 = vector.load %arg3[%c0_4, %c0_5, %c0_6] : memref<1x8x128xi32, #tpu.memory_space<vmem>>, vector<1x8x128xi32>
    %6 = vector.shape_cast %5 : vector<1x8x128xi32> to vector<8x128xi32>
    %c255_i32 = arith.constant 255 : i32
    %7 = vector.broadcast %c255_i32 : i32 to vector<8x128xi32>
    %8 = arith.cmpi ne, %6, %7 : vector<8x128xi32>
    %9 = vector.shape_cast %8 : vector<8x128xi1> to vector<1x8x128xi1>
    %cst = arith.constant 0.000000e+00 : f32
    %10 = vector.shape_cast %9 : vector<1x8x128xi1> to vector<1x8x128xi1>
    %11 = vector.broadcast %10 : vector<1x8x128xi1> to vector<4x8x128xi1>
    %12 = vector.broadcast %cst : f32 to vector<4x8x128xf32>
    %13 = arith.select %11, %4, %12 : vector<4x8x128xi1>, vector<4x8x128xf32>
    %cst_7 = arith.constant dense<0xFF800000> : vector<8x128xf32>
    %14 = vector.multi_reduction <maximumf>, %13, %cst_7 [0] : vector<4x8x128xf32> to vector<8x128xf32>
    %15 = vector.shape_cast %14 : vector<8x128xf32> to vector<1x8x128xf32>
    %16 = vector.broadcast %15 : vector<1x8x128xf32> to vector<4x8x128xf32>
    %17 = arith.subf %13, %16 : vector<4x8x128xf32>
    %18 = math.exp %17 : vector<4x8x128xf32>
    %cst_8 = arith.constant dense<0.000000e+00> : vector<8x128xf32>
    %19 = vector.multi_reduction <add>, %18, %cst_8 [0] : vector<4x8x128xf32> to vector<8x128xf32>
    %20 = vector.shape_cast %19 : vector<8x128xf32> to vector<1x8x128xf32>
    %21 = tpu.reciprocal %20 : vector<1x8x128xf32> -> vector<1x8x128xf32>
    %22 = vector.broadcast %21 : vector<1x8x128xf32> to vector<4x8x128xf32>
    %23 = arith.mulf %18, %22 : vector<4x8x128xf32>
    %24 = tpu.iota {dimensions = array<i32: 0>} : vector<4x8x128xi32>
    %25 = vector.shape_cast %6 : vector<8x128xi32> to vector<1x8x128xi32>
    %26 = vector.broadcast %25 : vector<1x8x128xi32> to vector<4x8x128xi32>
    %27 = arith.cmpi eq, %26, %24 : vector<4x8x128xi32>
    %28 = arith.extui %27 : vector<4x8x128xi1> to vector<4x8x128xi32>
    %29 = arith.sitofp %28 : vector<4x8x128xi32> to vector<4x8x128xf32>
    %c8_i32 = arith.constant 8 : i32
    %30 = arith.muli %arg1, %c8_i32 : i32
    %31 = tpu.iota {dimensions = array<i32: 0>} : vector<8x128xi32>
    %32 = vector.broadcast %30 : i32 to vector<8x128xi32>
    %33 = arith.addi %32, %31 : vector<8x128xi32>
    %34 = tpu.iota {dimensions = array<i32: 1>} : vector<8x128xi32>
    %c128_i32 = arith.constant 128 : i32
    %35 = vector.broadcast %c128_i32 : i32 to vector<8x128xi32>
    %36 = arith.muli %33, %35 : vector<8x128xi32>
    %37 = arith.addi %36, %34 : vector<8x128xi32>
    %c256_i32 = arith.constant 256 : i32
    %38 = vector.broadcast %c256_i32 : i32 to vector<8x128xi32>
    %39 = arith.cmpi slt, %37, %38 : vector<8x128xi32>
    %40 = arith.extui %39 : vector<8x128xi1> to vector<8x128xi32>
    %41 = arith.sitofp %40 : vector<8x128xi32> to vector<8x128xf32>
    %c0_9 = arith.constant 0 : index
    %c0_10 = arith.constant 0 : index
    %c0_11 = arith.constant 0 : index
    %42 = vector.load %arg6[%c0_9, %c0_10, %c0_11] : memref<4x8x128xf32, #tpu.memory_space<vmem>>, vector<4x8x128xf32>
    %43 = arith.mulf %23, %29 : vector<4x8x128xf32>
    %44 = arith.addf %42, %43 : vector<4x8x128xf32>
    %c0_12 = arith.constant 0 : index
    %c0_13 = arith.constant 0 : index
    %c0_14 = arith.constant 0 : index
    %45 = vector.load %arg6[%c0_12, %c0_13, %c0_14] : memref<4x8x128xf32, #tpu.memory_space<vmem>>, vector<4x8x128xf32>
    tpu.vector_store %arg6[%c0_12, %c0_13, %c0_14], %44 {strides = array<i32>} : memref<4x8x128xf32, #tpu.memory_space<vmem>>, vector<4x8x128xf32>,
    %c0_15 = arith.constant 0 : index
    %c0_16 = arith.constant 0 : index
    %c0_17 = arith.constant 0 : index
    %46 = vector.load %arg7[%c0_15, %c0_16, %c0_17] : memref<4x8x128xf32, #tpu.memory_space<vmem>>, vector<4x8x128xf32>
    %47 = vector.shape_cast %41 : vector<8x128xf32> to vector<1x8x128xf32>
    %48 = vector.broadcast %47 : vector<1x8x128xf32> to vector<4x8x128xf32>
    %49 = arith.mulf %23, %48 : vector<4x8x128xf32>
    %50 = arith.addf %49, %29 : vector<4x8x128xf32>
    %51 = arith.addf %46, %50 : vector<4x8x128xf32>
    %c0_18 = arith.constant 0 : index
    %c0_19 = arith.constant 0 : index
    %c0_20 = arith.constant 0 : index
    %52 = vector.load %arg7[%c0_18, %c0_19, %c0_20] : memref<4x8x128xf32, #tpu.memory_space<vmem>>, vector<4x8x128xf32>
    tpu.vector_store %arg7[%c0_18, %c0_19, %c0_20], %51 {strides = array<i32>} : memref<4x8x128xf32, #tpu.memory_space<vmem>>, vector<4x8x128xf32>,
    %c0_i32_21 = arith.constant 0 : i32
    %53 = arith.cmpi eq, %arg1, %c0_i32_21 : i32
    %54 = arith.extui %53 : i1 to i32
    %c0_i32_22 = arith.constant 0 : i32
    %55 = arith.cmpi ne, %54, %c0_i32_22 : i32
    scf.if %55 {
      %c0_23 = arith.constant 0 : index
      %c0_24 = arith.constant 0 : index
      %c0_25 = arith.constant 0 : index
      %56 = vector.load %arg6[%c0_23, %c0_24, %c0_25] : memref<4x8x128xf32, #tpu.memory_space<vmem>>, vector<4x8x128xf32>
      %cst_26 = arith.constant dense<0.000000e+00> : vector<4x8xf32>
      %57 = vector.multi_reduction <add>, %56, %cst_26 [2] : vector<4x8x128xf32> to vector<4x8xf32>
      %cst_27 = arith.constant dense<0.000000e+00> : vector<4xf32>
      %58 = vector.multi_reduction <add>, %57, %cst_27 [1] : vector<4x8xf32> to vector<4xf32>
      %59 = vector.shape_cast %58 : vector<4xf32> to vector<4x1xf32>
      %c0_28 = arith.constant 0 : index
      %c0_29 = arith.constant 0 : index
      %c0_30 = arith.constant 0 : index
      %60 = vector.load %arg4[%c0_28, %c0_29, %c0_30] : memref<1x4x1xf32, #tpu.memory_space<vmem>>, vector<1x4x1xf32>
      %61 = vector.shape_cast %60 : vector<1x4x1xf32> to vector<4x1xf32>
      %62 = vector.shape_cast %59 : vector<4x1xf32> to vector<1x4x1xf32>
      tpu.vector_store %arg4[%c0_28, %c0_29, %c0_30], %62 {strides = array<i32>} : memref<1x4x1xf32, #tpu.memory_space<vmem>>, vector<1x4x1xf32>,
      %c0_31 = arith.constant 0 : index
      %c0_32 = arith.constant 0 : index
      %c0_33 = arith.constant 0 : index
      %63 = vector.load %arg7[%c0_31, %c0_32, %c0_33] : memref<4x8x128xf32, #tpu.memory_space<vmem>>, vector<4x8x128xf32>
      %cst_34 = arith.constant dense<0.000000e+00> : vector<4x8xf32>
      %64 = vector.multi_reduction <add>, %63, %cst_34 [2] : vector<4x8x128xf32> to vector<4x8xf32>
      %cst_35 = arith.constant dense<0.000000e+00> : vector<4xf32>
      %65 = vector.multi_reduction <add>, %64, %cst_35 [1] : vector<4x8xf32> to vector<4xf32>
      %66 = vector.shape_cast %65 : vector<4xf32> to vector<4x1xf32>
      %c0_36 = arith.constant 0 : index
      %c0_37 = arith.constant 0 : index
      %c0_38 = arith.constant 0 : index
      %67 = vector.load %arg5[%c0_36, %c0_37, %c0_38] : memref<1x4x1xf32, #tpu.memory_space<vmem>>, vector<1x4x1xf32>
      %68 = vector.shape_cast %67 : vector<1x4x1xf32> to vector<4x1xf32>
      %69 = vector.shape_cast %66 : vector<4x1xf32> to vector<1x4x1xf32>
      tpu.vector_store %arg5[%c0_36, %c0_37, %c0_38], %69 {strides = array<i32>} : memref<1x4x1xf32, #tpu.memory_space<vmem>>, vector<1x4x1xf32>,
    } else {
    }
    return
  }
  func.func @transform_0(%arg0: i32, %arg1: i32) -> (i32, i32, i32, i32) {
    %c0_i32 = arith.constant 0 : i32
    %c0_i32_0 = arith.constant 0 : i32
    %c0_i32_1 = arith.constant 0 : i32
    return %arg0, %c0_i32, %arg1, %c0_i32_0 : i32, i32, i32, i32
  }
  func.func @transform_1(%arg0: i32, %arg1: i32) -> (i32, i32, i32) {
    %c0_i32 = arith.constant 0 : i32
    %c0_i32_0 = arith.constant 0 : i32
    return %arg0, %arg1, %c0_i32 : i32, i32, i32
  }
  func.func @transform_2(%arg0: i32, %arg1: i32) -> (i32, i32, i32) {
    %c0_i32 = arith.constant 0 : i32
    %c0_i32_0 = arith.constant 0 : i32
    %c0_i32_1 = arith.constant 0 : i32
    return %arg0, %c0_i32, %c0_i32_0 : i32, i32, i32
  }
  func.func @transform_3(%arg0: i32, %arg1: i32) -> (i32, i32, i32) {
    %c0_i32 = arith.constant 0 : i32
    %c0_i32_0 = arith.constant 0 : i32
    %c0_i32_1 = arith.constant 0 : i32
    return %arg0, %c0_i32, %c0_i32_0 : i32, i32, i32
  }
}

</mosaic_0001>

<bundles_post_ra>
// kernel: tpu_custom_call.1
= control target key start
LH: loop header
LB: loop body
LE: loop exit
PB: predicated region body
PF: predicated region fallthrough
CT: control target
= control target key end

     0   :  { %9 = vsyncpa [#allocation5], 0  ;;  %s993_s0 = inlined_call_operand.hbm [shape: f32[2,4,8,128], index: 0, kind: input, shape index: {}]   ;;  %s994_s1 = inlined_call_operand.hbm [shape: s32[2,8,128], index: 1, kind: input, shape index: {}]   ;;  %s995_s2 = inlined_call_operand.vmem [shape: f32[2,4,1], index: 2, kind: output, shape index: {0}]   ;;  %s996_s3 = inlined_call_operand.vmem [shape: f32[2,4,1], index: 3, kind: output, shape index: {1}]  }
   0x1   :  { %11 = vsyncpa [#allocation5 + $0x1], 0 }
   0x2   :  { %12 = vsyncpa [#allocation7], 0 }
   0x3   :  { %14 = vsyncpa [#allocation7 + $0x1], 0  ;;  %s816_s12 = smov 0   ;;  %s818_s13 = smov 0  }
   0x4   :  { %s820_s14 = smov 0   ;;  %s822_s15 = smov 0  }
   0x5   :  { %s824_s16 = smov 0   ;;  %s826_s17 = smov 0  }
   0x6 LB: > { %s580_s18 = sadd.s32 4294967295, %s789_s17   ;;  %s32_s19 = sadd.s32 1, %s785_s16  ;;  %s789_s17 = sphi %s826_s17, %s20_s17   ;;  %s785_s16 = sphi %s824_s16, %s1008_s16   ;;  %s781_s15 = sphi %s822_s15, %s1007_s15   ;;  %s777_s14 = sphi %s820_s14, %s1006_s14   ;;  %s773_s13 = sphi %s818_s13, %s1005_s13   ;;  %s769_s12 = sphi %s816_s12, %s1004_s12  }
   0x7   : > { %p34_p0 = scmp.ge.s32.totalorder %s32_s19, 2  ;;  %s41_s20 = sadd.s32 1, %s777_s14 }
   0x8   : > { %p48_p1 = scmp.ne.s32.totalorder %s777_s14, %s773_s13  ;;  %p49_p2 = scmp.eq.s32.totalorder %s789_s17, 0 }
   0x9   : > { %s1010_s19 = smov (%p34_p0, %s32_s19), 0  ;;  %p54_p4 = scmp.ne.s32.totalorder %s773_s13, %s769_s12 }
   0xa   : > { %p852_p3 = por %p49_p2, %p48_p1  ;;  %s36_s22 = ssub.s32 %s785_s16, %s1010_s19 }
   0xb   : > { %p55_p5 = scmp.eq.s32.totalorder %s580_s18, 0  ;;  %p39_p6 = scmp.eq.s32.totalorder %s36_s22, 0 }
   0xc   : > { %p613_p8 = scmp.lt.s32.totalorder %s789_s17, 2  ;;  %s868_s25 = sand.u32 1, %s777_s14  }
   0xd   : > { %p859_p7 = por %p55_p5, %p54_p4  ;;  %s601_s26 = sshll.u32 %s785_s16, 9 }
   0xe   : > { %s865_s24 = scalar_select %p39_p6, %s777_s14, %s41_s20  }
   0xf   : > { %s999_s23 = scalar_select %p859_p7, 1, 0 }
  0x10   : > { %s584_s27 = sshll.u32 %s868_s25, 5  ;;  %s875_s30 = scalar_lea.hbm %s993_s0, %s601_s26 }
  0x11   : > { %s162_s4 = scalar_lea.vmem [#allocation4], %s584_s27  ;;  %p879_p9 = pnand %p613_p8, %p852_p3 }
  0x12   : > { %s170_s5 = sshll.u32 %s162_s4, 4  ;;  %s159_s7 = scalar_lea.sflag [#allocation5], %s868_s25  ;;  %s883_s5 = int_to_ptr.vmem [resolvable:$true] %s170_s5 }
  0x13   : > { %s675_s8 = scalar_lea.hbm %s875_s30, 512  ;;  %p677_p11 = pneg %p879_p9 }
  0x14   : > { %p676_p10 = scmp.ne.s32.totalorder %s875_s30, %s675_s8  ;;  %s680_s11 = scalar_lea.hbm %s993_s0, 1024 }
  0x15   : > { %p681_p0 = scmp.lt.u32.totalorder %s875_s30, %s993_s0  ;;  %p682_p1 = scmp.lt.u32.totalorder %s680_s11, %s675_s8 }
  0x16   : > { %p678_p12 = pnand %p677_p11, %p676_p10  ;;  %p684_p3 = scmp.lt.u32.totalorder %s675_s8, %s875_s30 }
  0x17   : > { %p683_p2 = por %p682_p1, %p681_p0 }
  0x18   : > { %p679_p13 = pneg %p678_p12 }
  0x19   : > { %p685_p4 = por %p684_p3, %p683_p2 }
  0x1b   : > { %p686_p5 = pnand %p685_p4, %p679_p13 }
  0x1d   : > { %689 = shalt.err (!%p686_p5)
}
  0x1e   : > { %s690_s20 = scalar_lea.vmem %s883_s5, 512  ;;  %s791_s21 = smov [#allocation4]  }
  0x1f   : > { %p691_p6 = scmp.ne.s32.totalorder %s883_s5, %s690_s20  ;;  %s695_s22 = sshll.u32 %s791_s21, 4  ;;  %s696_s22 = int_to_ptr.vmem [resolvable:$false] %s695_s22 }
  0x20   : > { %s697_s26 = scalar_lea.vmem %s696_s22, 1024  ;;  %p698_p12 = scmp.lt.s32.totalorder %s883_s5, %s696_s22 }
  0x21   : > { %p693_p8 = pnand %p691_p6, %p677_p11  ;;  %p699_p0 = scmp.lt.s32.totalorder %s697_s26, %s690_s20 }
  0x23   : > { %p694_p10 = pneg %p693_p8  ;;  %p700_p1 = por %p699_p0, %p698_p12 }
  0x25   : > { %p701_p2 = pnand %p700_p1, %p694_p10 }
  0x27   : > { %704 = shalt.err (!%p701_p2)
}
  0x28   : > { %s792_s27 = smov 128   ;;  %s793_s28 = smov 8  }
  0x29   : > { %609 = dma.hbm_to_vmem [thread:$0]  (!%p879_p9), %s875_s30, 512, %s883_s5, %s159_s7, %s792_s27, %s792_s27, %s793_s28  }
  0x2a   : > { %p589_p13 = scmp.ge.s32.totalorder %s789_s17, 1  ;;  %p197_p3 = scmp.lt.s32.totalorder %s789_s17, 3 }
  0x2b   : > { %s587_s29 = sshll.u32 %s868_s25, 3  ;;  %s588_s8 = sshll.u32 %s785_s16, 7 }
  0x2c   : > { %p916_p4 = pnand %p589_p13, %p197_p3  ;;  %s184_s9 = scalar_lea.vmem [#allocation6], %s587_s29 }
  0x2d   : > { %s192_s10 = sshll.u32 %s184_s9, 4  ;;  %s924_s18 = scalar_lea.hbm %s994_s1, %s588_s8  ;;  %s193_s10 = int_to_ptr.vmem [resolvable:$true] %s192_s10 }
  0x2e   : > { %s1001_s4 = scalar_select %p916_p4, 1, 0 }
  0x2f   : > { %s181_s30 = scalar_lea.sflag [#allocation7], %s868_s25  ;;  %s705_s5 = scalar_lea.hbm %s924_s18, 128 }
  0x30   : > { %p706_p5 = scmp.ne.s32.totalorder %s924_s18, %s705_s5  ;;  %s710_s21 = scalar_lea.hbm %s994_s1, 256 }
  0x31   : > { %p711_p10 = scmp.lt.u32.totalorder %s924_s18, %s994_s1  ;;  %p712_p12 = scmp.lt.u32.totalorder %s710_s21, %s705_s5 }
  0x32   : > { %p708_p6 = pnand %p706_p5, %p677_p11  ;;  %p714_p1 = scmp.lt.u32.totalorder %s705_s5, %s924_s18 }
  0x33   : > { %p713_p0 = por %p712_p12, %p711_p10 }
  0x34   : > { %p709_p8 = pneg %p708_p6 }
  0x35   : > { %p715_p2 = por %p714_p1, %p713_p0 }
  0x37   : > { %p716_p13 = pnand %p715_p2, %p709_p8 }
  0x39   : > { %719 = shalt.err (!%p716_p13)
}
  0x3a   : > { %s720_s25 = scalar_lea.vmem %s193_s10, 128  ;;  %s794_s27 = smov [#allocation6]  }
  0x3b   : > { %p721_p3 = scmp.ne.s32.totalorder %s193_s10, %s720_s25  ;;  %s725_s28 = sshll.u32 %s794_s27, 4  ;;  %s726_s28 = int_to_ptr.vmem [resolvable:$false] %s725_s28 }
  0x3c   : > { %s727_s29 = scalar_lea.vmem %s726_s28, 256  ;;  %p728_p7 = scmp.lt.s32.totalorder %s193_s10, %s726_s28 }
  0x3d   : > { %p723_p5 = pnand %p721_p3, %p677_p11  ;;  %p729_p4 = scmp.lt.s32.totalorder %s727_s29, %s720_s25 }
  0x3f   : > { %p724_p6 = pneg %p723_p5  ;;  %p730_p10 = por %p729_p4, %p728_p7 }
  0x41   : > { %p731_p12 = pnand %p730_p10, %p724_p6 }
  0x43   : > { %734 = shalt.err (!%p731_p12)
}
  0x44   : > { %612 = dma.hbm_to_vmem [thread:$0]  (!%p879_p9), %s924_s18, 128, %s193_s10, %s181_s30  }
  0x45   : > { %p1002_p8 = scmp.ne.s32.totalorder %s1001_s4, 0 }
  0x46   : > { %s203_s8 = sand.u32 (!%p1002_p8), 1, %s773_s13   ;;  %p1003_p11 = scmp.ne.s32.totalorder (!%p1002_p8), %s999_s23, 0 }
  0x47   : > { %201 = sbr.rel (%p1002_p8) target bundleno = 430 (0x1ae), region = 28  ;;  %s590_s9 = sshll.u32 (!%p1002_p8), %s203_s8, 5 }
  0x48   : > { %s204_s11 = scalar_lea.sflag (!%p1002_p8), [#allocation5], %s203_s8  ;;  %s207_s12 = scalar_lea.vmem (!%p1002_p8), [#allocation4], %s590_s9 }
  0x4e   : > { %760 = dma.done.wait (%p1003_p11), %s204_s11, 512  }
  0x4f   : > { %762 = vsyncadd (%p1003_p11), %s204_s11, 4294966784  ;;  %s591_s5 = sshll.u32 %s203_s8, 3  ;;  %s213_s7 = scalar_lea.sflag [#allocation7], %s203_s8 }
  0x50   : > { %s216_s6 = scalar_lea.vmem [#allocation6], %s591_s5 }
  0x51   : > { %764 = dma.done.wait (%p1003_p11), %s213_s7, 128  }
  0x52   : > { %766 = vsyncadd (%p1003_p11), %s213_s7, 4294967168  ;;  %v315_v0 = vlaneseq  ;;  %v267_v4 = vld [vmem:[%s207_s12] sm:$0xff]  ;;  %v268_v5 = vld [vmem:[%s207_s12 + $0x8] sm:$0xff]  ;;  %v795_v34 = vmov 0.0   ;;  %vm397_vm6 = vcmask 1041409   ;;  %vm399_vm7 = vcmask 1042434  }
  0x53   : > { %v269_v6 = vld [vmem:[%s207_s12 + $0x10] sm:$0xff]  ;;  %v270_v7 = vld [vmem:[%s207_s12 + $0x18] sm:$0xff]  ;;  %v271_v8 = vld [vmem:[%s216_s6] sm:$0xff]  ;;  %vm401_vm8 = vcmask 1043459   ;;  %vm404_vm9 = vcmask 60416   ;;  %p247_p7 = scmp.lt.s32.totalorder %s781_s15, 1 }
  0x54   : > { %v316_v1 = vshrl.u32 %v315_v0, 7  ;;  %v320_v2 = vand.u32 127, %v315_v0  ;;  %vm272_vm0 = vcmp.ne.s32.totalorder %v271_v8, 255  ;;  %vm302_vm1 = vcmp.eq.s32.totalorder %v271_v8, 0 }
  0x55   : > { %v275_v9 = vsel %vm272_vm0, %v267_v4, 0.0  ;;  %v276_v10 = vsel %vm272_vm0, %v268_v5, 0.0  ;;  %v277_v11 = vsel %vm272_vm0, %v269_v6, 0.0  ;;  %v278_v12 = vsel %vm272_vm0, %v270_v7, 0.0  ;;  %s1012_s15 = smov (!%p247_p7, %s781_s15), 1 }
  0x56   : > { %v957_v3 = vsub.s32 %v320_v2, %v316_v1  ;;  %v279_v13 = vmax.f32 %v275_v9, %v276_v10  ;;  %v280_v14 = vmax.f32 %v277_v11, %v278_v12  ;;  %v321_v31 = vmul.u32 128, %v316_v1  ;;  %s592_s23 = sshll.u32 %s1012_s15, 2 }
  0x57   : > { %vm303_vm3 = vcmp.eq.s32.totalorder %v271_v8, 1  ;;  %v594_v35 = vsel %vm302_vm1, 1.0, %v795_v34  ;;  %vm304_vm4 = vcmp.eq.s32.totalorder %v271_v8, 2  ;;  %vm305_vm5 = vcmp.eq.s32.totalorder %v271_v8, 3  ;;  %s250_s18 = scalar_lea.vmem %s995_s2, %s592_s23  ;;  %s254_s21 = scalar_lea.vmem %s996_s3, %s592_s23 }
  0x58   : > { %v281_v15 = vmax.f32 %v279_v13, %v280_v14  ;;  %v322_v32 = vadd.s32 %v321_v31, %v320_v2  ;;  %v595_v39 = vsel %vm303_vm3, 1.0, %v795_v34  ;;  %v596_v46 = vsel %vm304_vm4, 1.0, %v795_v34 }
  0x59   : > { %v597_v51 = vsel %vm305_vm5, 1.0, %v795_v34  ;;  %vm408_vm10 = vcmask 3072  }
  0x5a   : > { %v282_v16 = vsub.f32 %v275_v9, %v281_v15  ;;  %v283_v17 = vsub.f32 %v276_v10, %v281_v15  ;;  %v284_v18 = vsub.f32 %v277_v11, %v281_v15  ;;  %v285_v19 = vsub.f32 %v278_v12, %v281_v15 }
  0x5b   : > { %vm323_vm2 = vcmp.lt.s32.totalorder %v322_v32, 256 }
  0x5c   : > { %v286_v20 = vmul.f32 1.442695, %v282_v16  ;;  %v288_v21 = vmul.f32 1.442695, %v283_v17  ;;  %v290_v22 = vmul.f32 1.442695, %v284_v18 }
  0x5d   : > { %v292_v23 = vmul.f32 1.442695, %v285_v19  ;;  %v598_v36 = vsel %vm323_vm2, 1.0, %v795_v34 }
  0x5e   : > { %665 = vpow2.f32 %v286_v20 }
  0x5f   : > { %667 = vpow2.f32 %v288_v21 }
  0x60   : > { %669 = vpow2.f32 %v290_v22 }
  0x61   : > { %671 = vpow2.f32 %v292_v23 }
  0x68   : > { %v666_v24 = vpop.eup %665 }
  0x69   : > { %v668_v25 = vpop.eup %667 }
  0x6a   : > { %v670_v26 = vpop.eup %669  ;;  %v294_v27 = vadd.f32 %v668_v25, %v666_v24 }
  0x6b   : > { %v672_v28 = vpop.eup %671 }
  0x6c   : > { %v295_v29 = vadd.f32 %v670_v26, %v294_v27 }
  0x6e   : > { %v296_v30 = vadd.f32 %v672_v28, %v295_v29 }
  0x70   : > { %673 = vrcp.f32 %v296_v30 }
  0x7a   : > { %v674_v33 = vpop.eup %673 }
  0x7b   : > { %v298_v37 = vmul.f32 %v674_v33, %v666_v24  ;;  %v299_v38 = vmul.f32 %v674_v33, %v668_v25  ;;  %v300_v43 = vmul.f32 %v674_v33, %v670_v26  ;;  %v301_v49 = vmul.f32 %v674_v33, %v672_v28 }
  0x7d   : > { %v330_v40 = vmul.f32 %v594_v35, %v298_v37  ;;  %v346_v41 = vmul.f32 %v598_v36, %v298_v37  ;;  %v347_v42 = vmul.f32 %v598_v36, %v299_v38  ;;  %v331_v45 = vmul.f32 %v595_v39, %v299_v38 }
  0x7e   : > { %v348_v48 = vmul.f32 %v598_v36, %v300_v43  ;;  %v332_v50 = vmul.f32 %v596_v46, %v300_v43  ;;  %v349_v53 = vmul.f32 %v598_v36, %v301_v49  ;;  %v333_v54 = vmul.f32 %v597_v51, %v301_v49 }
  0x7f   : > { %369 = vadd.xlane.f32.xlu0 %v330_v40  ;;  %v350_v44 = vadd.f32 %v594_v35, %v346_v41  ;;  %v351_v47 = vadd.f32 %v595_v39, %v347_v42 }
  0x80   : > { %v352_v52 = vadd.f32 %v596_v46, %v348_v48  ;;  %v353_v55 = vadd.f32 %v597_v51, %v349_v53 }
  0x81   : > { %414 = vadd.xlane.f32.xlu1 %v350_v44 }
  0x83   : > { %371 = vadd.xlane.f32.xlu0 %v331_v45 }
  0x85   : > { %416 = vadd.xlane.f32.xlu1 %v351_v47 }
  0x87   : > { %373 = vadd.xlane.f32.xlu0 %v332_v50 }
  0x89   : > { %418 = vadd.xlane.f32.xlu1 %v352_v52 }
  0x8b   : > { %375 = vadd.xlane.f32.xlu0 %v333_v54 }
  0x8d   : > { %420 = vadd.xlane.f32.xlu1 %v353_v55 }
 0x10c   : > { %v370_v56 = vpop.xlane.xlu0 %369 }
 0x10d   : > { %v384_v0 = vrot.slane %v370_v56, %v957_v3 }
 0x10e   : > { %v415_v57 = vpop.xlane.xlu1 %414 }
 0x10f   : > { %v429_v5 = vrot.slane %v415_v57, %v957_v3 }
 0x110   : > { %v372_v58 = vpop.xlane.xlu0 %371 }
 0x111   : > { %v388_v61 = vrot.slane %v372_v58, %v957_v3 }
 0x112   : > { %v417_v59 = vpop.xlane.xlu1 %416 }
 0x113   : > { %v433_v1 = vrot.slane %v417_v59, %v957_v3  ;;  %v398_v6 = vsel %vm397_vm6, %v388_v61, %v384_v0 }
 0x114   : > { %v374_v60 = vpop.xlane.xlu0 %373 }
 0x115   : > { %v392_v62 = vrot.slane %v374_v60, %v957_v3  ;;  %v442_v10 = vsel %vm397_vm6, %v433_v1, %v429_v5 }
 0x116   : > { %v419_v63 = vpop.xlane.xlu1 %418 }
 0x117   : > { %v437_v2 = vrot.slane %v419_v63, %v957_v3  ;;  %v400_v9 = vsel %vm399_vm7, %v392_v62, %v398_v6 }
 0x118   : > { %v376_v4 = vpop.xlane.xlu0 %375 }
 0x119   : > { %v396_v7 = vrot.slane %v376_v4, %v957_v3  ;;  %v443_v14 = vsel %vm399_vm7, %v437_v2, %v442_v10 }
 0x11a   : > { %v421_v8 = vpop.xlane.xlu1 %420 }
 0x11b   : > { %v441_v11 = vrot.slane %v421_v8, %v957_v3  ;;  %v402_v12 = vsel %vm401_vm8, %v396_v7, %v400_v9 }
 0x11c   : > { %v405_v13 = vsel %vm404_vm9, %v402_v12, 0.0 }
 0x11d   : > { %406 = vadd.xlane.f32.xlu0 %v405_v13  ;;  %v444_v15 = vsel %vm401_vm8, %v441_v11, %v443_v14 }
 0x11e   : > { %v446_v16 = vsel %vm404_vm9, %v444_v15, 0.0 }
 0x11f   : > { %447 = vadd.xlane.f32.xlu1 %v446_v16 }
 0x1aa   : > { %v407_v17 = vpop.xlane.xlu0 %406 }
 0x1ab   : > { %409 = vst.msk [vmem:[%s250_s18] sm:$0xf] %vm408_vm10, %v407_v17 }
 0x1ac   : > { %v448_v3 = vpop.xlane.xlu1 %447 }
 0x1ad   : > { %449 = vst.msk [vmem:[%s254_s21] sm:$0xf] %vm408_vm10, %v448_v3 }
 0x1ae PF: > { %s20_s17 = sadd.s32 1, %s789_s17   ;;  %s1004_s12 = smov %s773_s13 }
 0x1af   : > { %p17_p9 = scmp.ge.s32.totalorder %s20_s17, 4   ;;  %s1005_s13 = smov %s777_s14 }
 0x1b0   : > { %s1006_s14 = smov %s865_s24  ;;  %s1007_s15 = smov %s785_s16 }
 0x1b1   : > { %s1008_s16 = smov %s1010_s19  ;;  %19 = sbr.rel (!%p17_p9) target bundleno = 6 (0x6), region = 101 }
 0x1b8   :  { %483 = vsyncpa [#allocation5], 1 }
 0x1b9   :  { %485 = vsyncpa [#allocation5 + $0x1], 1 }
 0x1ba   :  { %486 = vsyncpa [#allocation7], 1 }
 0x1bb   :  { %488 = vsyncpa [#allocation7 + $0x1], 1 }

</bundles_post_ra>
